<compile_context>
chip_gen: v5e
topology: v5e:2x2
jax: 0.10.0
libtpu: 0.0.40
codegen_flags: <defaults>
</compile_context>

<pallas_src>
import functools

import jax
import jax.numpy as jnp
from jax.experimental import pallas as pl
from jax.experimental.pallas import tpu as pltpu


def _round_up(x, m):
    return (x + m - 1) // m * m


def _pad2(x, rows, cols):
    r, c = x.shape
    return jnp.zeros((rows, cols), x.dtype).at[:r, :c].set(x)


# ----------------------------------------------------------------------------
# Pallas kernels
# ----------------------------------------------------------------------------

def _spmm_square_kernel(l_ref, f_ref, o_ref, acc_ref):
    """Row-tile of  inter = L @ (f * f), accumulated over k-tiles of L."""
    k = pl.program_id(1)

    @pl.when(k == 0)
    def _():
        acc_ref[...] = jnp.zeros_like(acc_ref)

    f = f_ref[...]
    g = (f * f).astype(jnp.bfloat16)                 # torch.mul(features, features)
    acc_ref[...] += jnp.dot(l_ref[...], g, preferred_element_type=jnp.float32)

    @pl.when(k == pl.num_programs(1) - 1)
    def _():
        o_ref[...] = acc_ref[...]


def _spmm_linear_relu_kernel(l_ref, x_ref, w_ref, b_ref, o_ref, acc_ref):
    """Row-tile of  out = relu( (L @ x) @ W + b ), accumulated over k-tiles of L."""
    k = pl.program_id(1)

    @pl.when(k == 0)
    def _():
        acc_ref[...] = jnp.zeros_like(acc_ref)

    acc_ref[...] += jnp.dot(l_ref[...], x_ref[...].astype(jnp.bfloat16),
                            preferred_element_type=jnp.float32)

    @pl.when(k == pl.num_programs(1) - 1)
    def _():
        y = jnp.dot(acc_ref[...].astype(jnp.bfloat16), w_ref[...],
                    preferred_element_type=jnp.float32) + b_ref[...]
        o_ref[...] = jnp.maximum(y, 0.0)             # ReLU applied in NGCF_layer.forward


def _head_kernel(u_ref, i_ref, w1u_ref, w1i_ref, b1_ref,
                 w2_ref, b2_ref, wmf_ref, wmlp_ref, bout_ref, o_ref):
    """NGCFMFMLP head.

    ngcfmf = u * i
    h1     = relu( cat([u, i]) @ W1^T + b1 )   (split as u@W1u + i@W1i, exact)
    h2     = relu( h1 @ W2^T + b2 )
    out    = cat([ngcfmf, h2]) @ Wout^T + bout (width-1 matmuls -> VPU reductions)
    """
    u = u_ref[...]
    it = i_ref[...]
    mf = u * it
    h1 = jnp.dot(u, w1u_ref[...], preferred_element_type=jnp.float32)
    h1 = h1 + jnp.dot(it, w1i_ref[...], preferred_element_type=jnp.float32)
    h1 = jnp.maximum(h1 + b1_ref[...], 0.0)
    h2 = jnp.dot(h1, w2_ref[...], preferred_element_type=jnp.float32) + b2_ref[...]
    h2 = jnp.maximum(h2, 0.0)
    out = jnp.sum(mf * wmf_ref[...], axis=-1, keepdims=True)
    out = out + jnp.sum(h2 * wmlp_ref[...], axis=-1, keepdims=True)
    o_ref[...] = out + bout_ref[0]


# ----------------------------------------------------------------------------
# Pallas wrappers
# ----------------------------------------------------------------------------

_VMEM_LIMIT = 32 * 1024 * 1024   # safe on v5e/v6e/v7x; our tiles use ~a few MiB


def _gnn_compiler_params():
    return pltpu.CompilerParams(
        dimension_semantics=("parallel", "arbitrary"),
        vmem_limit_bytes=_VMEM_LIMIT)


def spmm_square(L_pad, feat_pad, tile):
    """inter = L @ (feat*feat); L_pad bf16 (Np,Np), feat_pad f32 (Np,Fp)."""
    Np = L_pad.shape[0]
    Fp = feat_pad.shape[1]
    grid = (Np // tile, Np // tile)
    cost = pl.CostEstimate(
        flops=2 * Np * Np * Fp + Np * Fp,
        transcendentals=0,
        bytes_accessed=Np * Np * 2 + (Np // tile) * Np * Fp * 4 + Np * Fp * 4)
    return pl.pallas_call(
        _spmm_square_kernel,
        out_shape=jax.ShapeDtypeStruct((Np, Fp), jnp.float32),
        grid_spec=pltpu.PrefetchScalarGridSpec(
            num_scalar_prefetch=0, grid=grid,
            in_specs=[pl.BlockSpec((tile, tile), lambda i, k: (i, k)),
                      pl.BlockSpec((tile, Fp), lambda i, k: (k, 0))],
            out_specs=pl.BlockSpec((tile, Fp), lambda i, k: (i, 0)),
            scratch_shapes=[pltpu.VMEM((tile, Fp), jnp.float32)]),
        compiler_params=_gnn_compiler_params(),
        cost_estimate=cost,
    )(L_pad, feat_pad)


def spmm_linear_relu(L_pad, x_pad, w_pad, b_pad, tile):
    """out = relu((L @ x) @ W + b); W bf16 (Fpi,Fpo), b f32 (1,Fpo)."""
    Np = L_pad.shape[0]
    Fpi = x_pad.shape[1]
    Fpo = w_pad.shape[1]
    grid = (Np // tile, Np // tile)
    cost = pl.CostEstimate(
        flops=2 * Np * Np * Fpi + 2 * Np * Fpi * Fpo,
        transcendentals=0,
        bytes_accessed=Np * Np * 2 + (Np // tile) * Np * Fpi * 4 + Np * Fpo * 4)
    return pl.pallas_call(
        _spmm_linear_relu_kernel,
        out_shape=jax.ShapeDtypeStruct((Np, Fpo), jnp.float32),
        grid_spec=pltpu.PrefetchScalarGridSpec(
            num_scalar_prefetch=0, grid=grid,
            in_specs=[pl.BlockSpec((tile, tile), lambda i, k: (i, k)),
                      pl.BlockSpec((tile, Fpi), lambda i, k: (k, 0)),
                      pl.BlockSpec((Fpi, Fpo), lambda i, k: (0, 0)),
                      pl.BlockSpec((1, Fpo), lambda i, k: (0, 0))],
            out_specs=pl.BlockSpec((tile, Fpo), lambda i, k: (i, 0)),
            scratch_shapes=[pltpu.VMEM((tile, Fpo), jnp.float32)]),
        compiler_params=_gnn_compiler_params(),
        cost_estimate=cost,
    )(L_pad, x_pad, w_pad, b_pad)


def head(u, it, w1u, w1i, b1, w2, b2, wmf, wmlp, bout):
    B = u.shape[0]
    vmem = lambda: pl.BlockSpec(memory_space=pltpu.MemorySpace.VMEM)
    smem = lambda: pl.BlockSpec(memory_space=pltpu.MemorySpace.SMEM)
    # TODO(synk): add a grid over the batch axis (weights resident, B parallel)
    # if this is ever called at serving-sized batches instead of B ~ O(10).
    return pl.pallas_call(
        _head_kernel,
        out_shape=jax.ShapeDtypeStruct((B, 1), jnp.float32),
        in_specs=[vmem() for _ in range(9)] + [smem()],
        out_specs=vmem(),
        compiler_params=pltpu.CompilerParams(vmem_limit_bytes=_VMEM_LIMIT),
    )(u, it, w1u, w1i, b1, w2, b2, wmf, wmlp, bout)


# ----------------------------------------------------------------------------
# Parameter construction (deterministic, mirrors the PyTorch __init__)
# ----------------------------------------------------------------------------

def xavier_uniform(key, out_features, in_features):
    bound = jnp.sqrt(6.0 / (in_features + out_features))
    return jax.random.uniform(key, (out_features, in_features),
                              minval=-bound, maxval=bound, dtype=jnp.float32)


def build_params(key, user_num, item_num, embed_size, layers):
    keys = jax.random.split(key, 16)
    params = {}
    # NGCF embeddings (normal, std=0.01)
    params["uEmbd"] = 0.01 * jax.random.normal(keys[0], (user_num, embed_size), jnp.float32)
    params["iEmbd"] = 0.01 * jax.random.normal(keys[1], (item_num, embed_size), jnp.float32)
    # GNN layers (linear only -- interActTransform is unused in GNNLayer.forward).
    # Weights stored transposed, zero-padded to 128-lane widths, and cast bf16.
    gnn = []
    for idx, (f_in, f_out) in enumerate(zip(layers[:-1], layers[1:])):
        w = xavier_uniform(keys[2 + idx], f_out, f_in)          # torch shape (out, in)
        w_t = jnp.transpose(w)                                   # (in, out)
        fpi, fpo = _round_up(f_in, 128), _round_up(f_out, 128)
        w_pad = _pad2(w_t, fpi, fpo).astype(jnp.bfloat16)
        b_pad = jnp.zeros((1, fpo), jnp.float32)
        gnn.append((w_pad, b_pad))
    params["gnn"] = gnn
    sum_l = sum(layers)
    # CFMLP
    w1 = xavier_uniform(keys[8], sum_l, 2 * sum_l)               # (S, 2S)
    params["w1u_t"] = jnp.transpose(w1[:, :sum_l])               # (S, S)
    params["w1i_t"] = jnp.transpose(w1[:, sum_l:])               # (S, S)
    params["b1"] = jnp.zeros((1, sum_l), jnp.float32)
    w2 = xavier_uniform(keys[9], embed_size, sum_l)              # (E, S)
    params["w2_t"] = jnp.transpose(w2)                           # (S, E)
    params["b2"] = jnp.zeros((1, embed_size), jnp.float32)
    # NGCFMFMLP_layer also has an `output` Linear, but it is unused in forward.
    # Top-level NGCFMFMLP.output : Linear(sum(layers)+embedSize -> 1)
    wout = xavier_uniform(keys[10], 1, sum_l + embed_size)       # (1, S+E)
    params["wmf_row"] = wout[:, :sum_l]                          # (1, S)
    params["wmlp_row"] = wout[:, sum_l:]                         # (1, E)
    params["bout"] = jnp.zeros((1,), jnp.float32)
    return params


def build_laplacian(key, user_num, item_num):
    """Deterministic dense symmetric-normalized bipartite adjacency (stand-in for `adj`)."""
    n = user_num + item_num
    r = (jax.random.uniform(key, (user_num, item_num)) < 0.3).astype(jnp.float32)
    a = jnp.zeros((n, n), jnp.float32)
    a = a.at[:user_num, user_num:].set(r)
    a = a.at[user_num:, :user_num].set(r.T)
    deg = jnp.sum(a, axis=1)
    d_inv_sqrt = jnp.where(deg > 0, 1.0 / jnp.sqrt(jnp.maximum(deg, 1e-12)), 0.0)
    return (d_inv_sqrt[:, None] * a) * d_inv_sqrt[None, :]


def pick_tiling(n):
    """Tile size (multiple of 128) and padded N (multiple of tile)."""
    n_pad = _round_up(n, 128)
    tile = min(512, n_pad)
    n_pad = _round_up(n_pad, tile)
    return n_pad, tile


def prep_laplacian(L, tile_n_pad):
    """Pad L to (Np, Np) and cast to bf16 (halves HBM bytes of the dominant operand)."""
    n_pad, _ = tile_n_pad
    return _pad2(L, n_pad, n_pad).astype(jnp.bfloat16)


# ----------------------------------------------------------------------------
# Forward pass
# ----------------------------------------------------------------------------

@functools.partial(jax.jit, static_argnames=("user_num", "layers", "tile"))
def ngcfmfmlp_forward(params, L_pad, user_idx, item_idx, *, user_num, layers, tile):
    N = params["uEmbd"].shape[0] + params["iEmbd"].shape[0]
    N_pad = L_pad.shape[0]

    # NGCF_layer: feature matrix = cat(user embeddings, item embeddings)
    feats0 = jnp.concatenate([params["uEmbd"], params["iEmbd"]], axis=0)   # (N, E)
    feat_pad = _pad2(feats0, N_pad, _round_up(layers[0], 128))             # lane-dense
    final_parts = [feats0]

    for li, (w_pad, b_pad) in enumerate(params["gnn"]):
        f_out = layers[li + 1]
        inter = spmm_square(L_pad, feat_pad, tile)                  # L @ (f*f)   (Pallas)
        feat_pad = spmm_linear_relu(L_pad, inter, w_pad, b_pad, tile)  # relu((L@inter)W+b)
        final_parts.append(feat_pad[:N, :f_out])                    # slice off padding

    final_embd = jnp.concatenate(final_parts, axis=1)               # (N, sum(layers))

    # NGCFMFMLP_layer head
    item_idx_shifted = item_idx + user_num
    user_embd = jnp.take(final_embd, user_idx, axis=0)              # glue: row gather
    item_embd = jnp.take(final_embd, item_idx_shifted, axis=0)

    out = head(user_embd, item_embd,
               params["w1u_t"], params["w1i_t"], params["b1"],
               params["w2_t"], params["b2"],
               params["wmf_row"], params["wmlp_row"], params["bout"])   # (B, 1), Pallas
    return out.reshape(-1)                                              # .flatten()


if __name__ == "__main__":
    user_num, item_num = 12, 20
    embed_size = 8
    layers = (8, 16, 8)          # layers[0] == embedSize (required by the torch module's dims)
    batch = 6

    key = jax.random.PRNGKey(0)
    k_params, k_adj, k_u, k_i = jax.random.split(key, 4)

    params = build_params(k_params, user_num, item_num, embed_size, layers)
    L = build_laplacian(k_adj, user_num, item_num)

    N = user_num + item_num
    n_pad, tile = pick_tiling(N)
    L_pad = prep_laplacian(L, (n_pad, tile))

    user_idx = jax.random.randint(k_u, (batch,), 0, user_num)
    item_idx = jax.random.randint(k_i, (batch,), 0, item_num)

    out = ngcfmfmlp_forward(params, L_pad, user_idx, item_idx,
                            user_num=user_num, layers=layers, tile=tile)
    jax.block_until_ready(out)
    assert out.shape == (batch,) and out.dtype == jnp.float32
    print("KERNEL_OK")
</pallas_src>

<mosaic_0001>
module attributes {stable_mosaic.version = 11 : i64} {
  func.func @_spmm_square_kernel(%arg0: i32, %arg1: i32, %arg2: memref<128x128xbf16, #tpu.memory_space<vmem>>, %arg3: memref<128x128xf32, #tpu.memory_space<vmem>>, %arg4: memref<128x128xf32, #tpu.memory_space<vmem>>, %arg5: memref<128x128xf32, #tpu.memory_space<vmem>>) attributes {dimension_semantics = [#tpu.dimension_semantics<parallel>, #tpu.dimension_semantics<arbitrary>], iteration_bounds = array<i64: 1, 1>, scalar_prefetch = 0 : i64, scratch_operands = 1 : i64, tpu.core_type = #tpu.core_type<tc>, window_params = [{transform_indices = @transform_0, window_bounds = array<i64: 128, 128>}, {transform_indices = @transform_1, window_bounds = array<i64: 128, 128>}, {transform_indices = @transform_2, window_bounds = array<i64: 128, 128>}]} {
    %c0_i32 = arith.constant 0 : i32
    %0 = arith.cmpi eq, %arg1, %c0_i32 : i32
    %1 = arith.extui %0 : i1 to i32
    %c0_i32_0 = arith.constant 0 : i32
    %2 = arith.cmpi ne, %1, %c0_i32_0 : i32
    scf.if %2 {
      %cst_10 = arith.constant 0.000000e+00 : f32
      %14 = vector.broadcast %cst_10 : f32 to vector<128x128xf32>
      %c0_11 = arith.constant 0 : index
      %c0_12 = arith.constant 0 : index
      %15 = vector.load %arg5[%c0_11, %c0_12] : memref<128x128xf32, #tpu.memory_space<vmem>>, vector<128x128xf32>
      tpu.vector_store %arg5[%c0_11, %c0_12], %14 {strides = array<i32>} : memref<128x128xf32, #tpu.memory_space<vmem>>, vector<128x128xf32>,
    } else {
    }
    %c0 = arith.constant 0 : index
    %c0_1 = arith.constant 0 : index
    %3 = vector.load %arg3[%c0, %c0_1] : memref<128x128xf32, #tpu.memory_space<vmem>>, vector<128x128xf32>
    %4 = arith.mulf %3, %3 : vector<128x128xf32>
    %5 = arith.truncf %4 : vector<128x128xf32> to vector<128x128xbf16>
    %c0_2 = arith.constant 0 : index
    %c0_3 = arith.constant 0 : index
    %6 = vector.load %arg5[%c0_2, %c0_3] : memref<128x128xf32, #tpu.memory_space<vmem>>, vector<128x128xf32>
    %c0_4 = arith.constant 0 : index
    %c0_5 = arith.constant 0 : index
    %7 = vector.load %arg2[%c0_4, %c0_5] : memref<128x128xbf16, #tpu.memory_space<vmem>>, vector<128x128xbf16>
    %cst = arith.constant dense<0.000000e+00> : vector<128x128xf32>
    %8 = tpu.matmul %7, %5, %cst {dimension_numbers = #tpu.dot_dimension_numbers<[1], [0], [0], [1], [0, 0, 1, 1], [], []>} : vector<128x128xbf16>, vector<128x128xbf16>, vector<128x128xf32> -> vector<128x128xf32>
    %9 = arith.addf %6, %8 : vector<128x128xf32>
    %c0_6 = arith.constant 0 : index
    %c0_7 = arith.constant 0 : index
    %10 = vector.load %arg5[%c0_6, %c0_7] : memref<128x128xf32, #tpu.memory_space<vmem>>, vector<128x128xf32>
    tpu.vector_store %arg5[%c0_6, %c0_7], %9 {strides = array<i32>} : memref<128x128xf32, #tpu.memory_space<vmem>>, vector<128x128xf32>,
    %c0_i32_8 = arith.constant 0 : i32
    %11 = arith.cmpi eq, %arg1, %c0_i32_8 : i32
    %12 = arith.extui %11 : i1 to i32
    %c0_i32_9 = arith.constant 0 : i32
    %13 = arith.cmpi ne, %12, %c0_i32_9 : i32
    scf.if %13 {
      %c0_10 = arith.constant 0 : index
      %c0_11 = arith.constant 0 : index
      %14 = vector.load %arg5[%c0_10, %c0_11] : memref<128x128xf32, #tpu.memory_space<vmem>>, vector<128x128xf32>
      %c0_12 = arith.constant 0 : index
      %c0_13 = arith.constant 0 : index
      %15 = vector.load %arg4[%c0_12, %c0_13] : memref<128x128xf32, #tpu.memory_space<vmem>>, vector<128x128xf32>
      tpu.vector_store %arg4[%c0_12, %c0_13], %14 {strides = array<i32>} : memref<128x128xf32, #tpu.memory_space<vmem>>, vector<128x128xf32>,
    } else {
    }
    return
  }
  func.func @transform_0(%arg0: i32, %arg1: i32) -> (i32, i32) {
    %c0_i32 = arith.constant 0 : i32
    return %arg0, %arg1 : i32, i32
  }
  func.func @transform_1(%arg0: i32, %arg1: i32) -> (i32, i32) {
    %c0_i32 = arith.constant 0 : i32
    %c0_i32_0 = arith.constant 0 : i32
    return %arg1, %c0_i32 : i32, i32
  }
  func.func @transform_2(%arg0: i32, %arg1: i32) -> (i32, i32) {
    %c0_i32 = arith.constant 0 : i32
    %c0_i32_0 = arith.constant 0 : i32
    return %arg0, %c0_i32 : i32, i32
  }
}

module attributes {stable_mosaic.version = 11 : i64} {
  func.func @_spmm_linear_relu_kernel(%arg0: i32, %arg1: i32, %arg2: memref<128x128xbf16, #tpu.memory_space<vmem>>, %arg3: memref<128x128xf32, #tpu.memory_space<vmem>>, %arg4: memref<128x128xbf16, #tpu.memory_space<vmem>>, %arg5: memref<1x128xf32, #tpu.memory_space<vmem>>, %arg6: memref<128x128xf32, #tpu.memory_space<vmem>>, %arg7: memref<128x128xf32, #tpu.memory_space<vmem>>) attributes {dimension_semantics = [#tpu.dimension_semantics<parallel>, #tpu.dimension_semantics<arbitrary>], iteration_bounds = array<i64: 1, 1>, scalar_prefetch = 0 : i64, scratch_operands = 1 : i64, tpu.core_type = #tpu.core_type<tc>, window_params = [{transform_indices = @transform_0, window_bounds = array<i64: 128, 128>}, {transform_indices = @transform_1, window_bounds = array<i64: 128, 128>}, {pipeline_mode = #tpu.pipeline_mode<synchronous>, transform_indices = @transform_2, window_bounds = array<i64: 128, 128>}, {pipeline_mode = #tpu.pipeline_mode<synchronous>, transform_indices = @transform_3, window_bounds = array<i64: 1, 128>}, {transform_indices = @transform_4, window_bounds = array<i64: 128, 128>}]} {
    %c0_i32 = arith.constant 0 : i32
    %0 = arith.cmpi eq, %arg1, %c0_i32 : i32
    %1 = arith.extui %0 : i1 to i32
    %c0_i32_0 = arith.constant 0 : i32
    %2 = arith.cmpi ne, %1, %c0_i32_0 : i32
    scf.if %2 {
      %cst_10 = arith.constant 0.000000e+00 : f32
      %13 = vector.broadcast %cst_10 : f32 to vector<128x128xf32>
      %c0_11 = arith.constant 0 : index
      %c0_12 = arith.constant 0 : index
      %14 = vector.load %arg7[%c0_11, %c0_12] : memref<128x128xf32, #tpu.memory_space<vmem>>, vector<128x128xf32>
      tpu.vector_store %arg7[%c0_11, %c0_12], %13 {strides = array<i32>} : memref<128x128xf32, #tpu.memory_space<vmem>>, vector<128x128xf32>,
    } else {
    }
    %c0 = arith.constant 0 : index
    %c0_1 = arith.constant 0 : index
    %3 = vector.load %arg7[%c0, %c0_1] : memref<128x128xf32, #tpu.memory_space<vmem>>, vector<128x128xf32>
    %c0_2 = arith.constant 0 : index
    %c0_3 = arith.constant 0 : index
    %4 = vector.load %arg2[%c0_2, %c0_3] : memref<128x128xbf16, #tpu.memory_space<vmem>>, vector<128x128xbf16>
    %c0_4 = arith.constant 0 : index
    %c0_5 = arith.constant 0 : index
    %5 = vector.load %arg3[%c0_4, %c0_5] : memref<128x128xf32, #tpu.memory_space<vmem>>, vector<128x128xf32>
    %6 = arith.truncf %5 : vector<128x128xf32> to vector<128x128xbf16>
    %cst = arith.constant dense<0.000000e+00> : vector<128x128xf32>
    %7 = tpu.matmul %4, %6, %cst {dimension_numbers = #tpu.dot_dimension_numbers<[1], [0], [0], [1], [0, 0, 1, 1], [], []>} : vector<128x128xbf16>, vector<128x128xbf16>, vector<128x128xf32> -> vector<128x128xf32>
    %8 = arith.addf %3, %7 : vector<128x128xf32>
    %c0_6 = arith.constant 0 : index
    %c0_7 = arith.constant 0 : index
    %9 = vector.load %arg7[%c0_6, %c0_7] : memref<128x128xf32, #tpu.memory_space<vmem>>, vector<128x128xf32>
    tpu.vector_store %arg7[%c0_6, %c0_7], %8 {strides = array<i32>} : memref<128x128xf32, #tpu.memory_space<vmem>>, vector<128x128xf32>,
    %c0_i32_8 = arith.constant 0 : i32
    %10 = arith.cmpi eq, %arg1, %c0_i32_8 : i32
    %11 = arith.extui %10 : i1 to i32
    %c0_i32_9 = arith.constant 0 : i32
    %12 = arith.cmpi ne, %11, %c0_i32_9 : i32
    scf.if %12 {
      %c0_10 = arith.constant 0 : index
      %c0_11 = arith.constant 0 : index
      %13 = vector.load %arg7[%c0_10, %c0_11] : memref<128x128xf32, #tpu.memory_space<vmem>>, vector<128x128xf32>
      %14 = arith.truncf %13 : vector<128x128xf32> to vector<128x128xbf16>
      %c0_12 = arith.constant 0 : index
      %c0_13 = arith.constant 0 : index
      %15 = vector.load %arg4[%c0_12, %c0_13] : memref<128x128xbf16, #tpu.memory_space<vmem>>, vector<128x128xbf16>
      %cst_14 = arith.constant dense<0.000000e+00> : vector<128x128xf32>
      %16 = tpu.matmul %14, %15, %cst_14 {dimension_numbers = #tpu.dot_dimension_numbers<[1], [0], [0], [1], [0, 0, 1, 1], [], []>} : vector<128x128xbf16>, vector<128x128xbf16>, vector<128x128xf32> -> vector<128x128xf32>
      %c0_15 = arith.constant 0 : index
      %c0_16 = arith.constant 0 : index
      %17 = vector.load %arg5[%c0_15, %c0_16] : memref<1x128xf32, #tpu.memory_space<vmem>>, vector<1x128xf32>
      %18 = vector.broadcast %17 : vector<1x128xf32> to vector<128x128xf32>
      %19 = arith.addf %16, %18 : vector<128x128xf32>
      %cst_17 = arith.constant 0.000000e+00 : f32
      %20 = vector.broadcast %cst_17 : f32 to vector<128x128xf32>
      %21 = arith.maximumf %19, %20 : vector<128x128xf32>
      %c0_18 = arith.constant 0 : index
      %c0_19 = arith.constant 0 : index
      %22 = vector.load %arg6[%c0_18, %c0_19] : memref<128x128xf32, #tpu.memory_space<vmem>>, vector<128x128xf32>
      tpu.vector_store %arg6[%c0_18, %c0_19], %21 {strides = array<i32>} : memref<128x128xf32, #tpu.memory_space<vmem>>, vector<128x128xf32>,
    } else {
    }
    return
  }
  func.func @transform_0(%arg0: i32, %arg1: i32) -> (i32, i32) {
    %c0_i32 = arith.constant 0 : i32
    return %arg0, %arg1 : i32, i32
  }
  func.func @transform_1(%arg0: i32, %arg1: i32) -> (i32, i32) {
    %c0_i32 = arith.constant 0 : i32
    %c0_i32_0 = arith.constant 0 : i32
    return %arg1, %c0_i32 : i32, i32
  }
  func.func @transform_2(%arg0: i32, %arg1: i32) -> (i32, i32) {
    %c0_i32 = arith.constant 0 : i32
    %c0_i32_0 = arith.constant 0 : i32
    %c0_i32_1 = arith.constant 0 : i32
    return %c0_i32, %c0_i32_0 : i32, i32
  }
  func.func @transform_3(%arg0: i32, %arg1: i32) -> (i32, i32) {
    %c0_i32 = arith.constant 0 : i32
    %c0_i32_0 = arith.constant 0 : i32
    %c0_i32_1 = arith.constant 0 : i32
    return %c0_i32, %c0_i32_0 : i32, i32
  }
  func.func @transform_4(%arg0: i32, %arg1: i32) -> (i32, i32) {
    %c0_i32 = arith.constant 0 : i32
    %c0_i32_0 = arith.constant 0 : i32
    return %arg0, %c0_i32 : i32, i32
  }
}

module attributes {stable_mosaic.version = 11 : i64} {
  func.func @_head_kernel(%arg0: memref<6x32xf32, #tpu.memory_space<vmem>>, %arg1: memref<6x32xf32, #tpu.memory_space<vmem>>, %arg2: memref<32x32xf32, #tpu.memory_space<vmem>>, %arg3: memref<32x32xf32, #tpu.memory_space<vmem>>, %arg4: memref<1x32xf32, #tpu.memory_space<vmem>>, %arg5: memref<32x8xf32, #tpu.memory_space<vmem>>, %arg6: memref<1x8xf32, #tpu.memory_space<vmem>>, %arg7: memref<1x32xf32, #tpu.memory_space<vmem>>, %arg8: memref<1x8xf32, #tpu.memory_space<vmem>>, %arg9: memref<1xf32, #tpu.memory_space<smem>>, %arg10: memref<6x1xf32, #tpu.memory_space<vmem>>) attributes {dimension_semantics = [], scalar_prefetch = 0 : i64, scratch_operands = 0 : i64, tpu.core_type = #tpu.core_type<tc>} {
    %c0 = arith.constant 0 : index
    %c0_0 = arith.constant 0 : index
    %0 = vector.load %arg0[%c0, %c0_0] : memref<6x32xf32, #tpu.memory_space<vmem>>, vector<6x32xf32>
    %c0_1 = arith.constant 0 : index
    %c0_2 = arith.constant 0 : index
    %1 = vector.load %arg1[%c0_1, %c0_2] : memref<6x32xf32, #tpu.memory_space<vmem>>, vector<6x32xf32>
    %2 = arith.mulf %0, %1 : vector<6x32xf32>
    %c0_3 = arith.constant 0 : index
    %c0_4 = arith.constant 0 : index
    %3 = vector.load %arg2[%c0_3, %c0_4] : memref<32x32xf32, #tpu.memory_space<vmem>>, vector<32x32xf32>
    %cst = arith.constant dense<0.000000e+00> : vector<6x32xf32>
    %4 = tpu.matmul %0, %3, %cst {dimension_numbers = #tpu.dot_dimension_numbers<[1], [0], [0], [1], [0, 0, 1, 1], [], []>} : vector<6x32xf32>, vector<32x32xf32>, vector<6x32xf32> -> vector<6x32xf32>
    %c0_5 = arith.constant 0 : index
    %c0_6 = arith.constant 0 : index
    %5 = vector.load %arg3[%c0_5, %c0_6] : memref<32x32xf32, #tpu.memory_space<vmem>>, vector<32x32xf32>
    %cst_7 = arith.constant dense<0.000000e+00> : vector<6x32xf32>
    %6 = tpu.matmul %1, %5, %cst_7 {dimension_numbers = #tpu.dot_dimension_numbers<[1], [0], [0], [1], [0, 0, 1, 1], [], []>} : vector<6x32xf32>, vector<32x32xf32>, vector<6x32xf32> -> vector<6x32xf32>
    %7 = arith.addf %4, %6 : vector<6x32xf32>
    %c0_8 = arith.constant 0 : index
    %c0_9 = arith.constant 0 : index
    %8 = vector.load %arg4[%c0_8, %c0_9] : memref<1x32xf32, #tpu.memory_space<vmem>>, vector<1x32xf32>
    %9 = vector.broadcast %8 : vector<1x32xf32> to vector<6x32xf32>
    %10 = arith.addf %7, %9 : vector<6x32xf32>
    %cst_10 = arith.constant 0.000000e+00 : f32
    %11 = vector.broadcast %cst_10 : f32 to vector<6x32xf32>
    %12 = arith.maximumf %10, %11 : vector<6x32xf32>
    %c0_11 = arith.constant 0 : index
    %c0_12 = arith.constant 0 : index
    %13 = vector.load %arg5[%c0_11, %c0_12] : memref<32x8xf32, #tpu.memory_space<vmem>>, vector<32x8xf32>
    %cst_13 = arith.constant dense<0.000000e+00> : vector<6x8xf32>
    %14 = tpu.matmul %12, %13, %cst_13 {dimension_numbers = #tpu.dot_dimension_numbers<[1], [0], [0], [1], [0, 0, 1, 1], [], []>} : vector<6x32xf32>, vector<32x8xf32>, vector<6x8xf32> -> vector<6x8xf32>
    %c0_14 = arith.constant 0 : index
    %c0_15 = arith.constant 0 : index
    %15 = vector.load %arg6[%c0_14, %c0_15] : memref<1x8xf32, #tpu.memory_space<vmem>>, vector<1x8xf32>
    %16 = vector.broadcast %15 : vector<1x8xf32> to vector<6x8xf32>
    %17 = arith.addf %14, %16 : vector<6x8xf32>
    %cst_16 = arith.constant 0.000000e+00 : f32
    %18 = vector.broadcast %cst_16 : f32 to vector<6x8xf32>
    %19 = arith.maximumf %17, %18 : vector<6x8xf32>
    %c0_17 = arith.constant 0 : index
    %c0_18 = arith.constant 0 : index
    %20 = vector.load %arg7[%c0_17, %c0_18] : memref<1x32xf32, #tpu.memory_space<vmem>>, vector<1x32xf32>
    %21 = vector.broadcast %20 : vector<1x32xf32> to vector<6x32xf32>
    %22 = arith.mulf %2, %21 : vector<6x32xf32>
    %cst_19 = arith.constant dense<0.000000e+00> : vector<6xf32>
    %23 = vector.multi_reduction <add>, %22, %cst_19 [1] : vector<6x32xf32> to vector<6xf32>
    %24 = vector.shape_cast %23 : vector<6xf32> to vector<6x1xf32>
    %c0_20 = arith.constant 0 : index
    %c0_21 = arith.constant 0 : index
    %25 = vector.load %arg8[%c0_20, %c0_21] : memref<1x8xf32, #tpu.memory_space<vmem>>, vector<1x8xf32>
    %26 = vector.broadcast %25 : vector<1x8xf32> to vector<6x8xf32>
    %27 = arith.mulf %19, %26 : vector<6x8xf32>
    %cst_22 = arith.constant dense<0.000000e+00> : vector<6xf32>
    %28 = vector.multi_reduction <add>, %27, %cst_22 [1] : vector<6x8xf32> to vector<6xf32>
    %29 = vector.shape_cast %28 : vector<6xf32> to vector<6x1xf32>
    %30 = arith.addf %24, %29 : vector<6x1xf32>
    %c0_23 = arith.constant 0 : index
    %31 = memref.load %arg9[%c0_23] : memref<1xf32, #tpu.memory_space<smem>>
    %32 = vector.broadcast %31 : f32 to vector<6x1xf32>
    %33 = arith.addf %30, %32 : vector<6x1xf32>
    %c0_24 = arith.constant 0 : index
    %c0_25 = arith.constant 0 : index
    %34 = vector.load %arg10[%c0_24, %c0_25] : memref<6x1xf32, #tpu.memory_space<vmem>>, vector<6x1xf32>
    tpu.vector_store %arg10[%c0_24, %c0_25], %33 {strides = array<i32>} : memref<6x1xf32, #tpu.memory_space<vmem>>, vector<6x1xf32>,
    return
  }
}

</mosaic_0001>

<bundles_post_ra>
// kernel: ngcfmfmlp_forward.9
= control target key start
LH: loop header
LB: loop body
LE: loop exit
PB: predicated region body
PF: predicated region fallthrough
CT: control target
= control target key end

     0   :  { %vm47_vm0 = vcmask 261120   ;;  %vm137_vm1 = vcmask 259072   ;;  %vm146_vm2 = vcmask 62464   ;;  %vm154_vm3 = vcmask 5120   ;;  %s285_s3 = inlined_call_operand.vmem [shape: f32[32,32], index: 3, kind: input, shape index: {}]   ;;  %s286_s2 = inlined_call_operand.vmem [shape: f32[32,32], index: 2, kind: input, shape index: {}]   ;;  %s287_s1 = inlined_call_operand.vmem [shape: f32[6,32], index: 1, kind: input, shape index: {}]   ;;  %s288_s0 = inlined_call_operand.vmem [shape: f32[6,32], index: 0, kind: input, shape index: {}]   ;;  %s289_s4 = inlined_call_operand.vmem [shape: f32[1,32], index: 4, kind: input, shape index: {}]   ;;  %s290_s6 = inlined_call_operand.vmem [shape: f32[1,8], index: 6, kind: input, shape index: {}]   ;;  %s291_s5 = inlined_call_operand.vmem [shape: f32[32,8], index: 5, kind: input, shape index: {}]   ;;  %s292_s7 = inlined_call_operand.vmem [shape: f32[1,32], index: 7, kind: input, shape index: {}]   ;;  %s293_s8 = inlined_call_operand.vmem [shape: f32[1,8], index: 8, kind: input, shape index: {}]   ;;  %s294_s9 = inlined_call_operand.<no memory space> [shape: f32[1], index: 9, kind: input, shape index: {}]   ;;  %s295_s10 = inlined_call_operand.vmem [shape: f32[6,1], index: 10, kind: output, shape index: {}]  }
   0x1   :  { %v46_v0 = vld [vmem:[%s285_s3 + $0x18] sm:$0xff]  ;;  %v45_v2 = vld [vmem:[%s285_s3 + $0x10] sm:$0xff]  ;;  %v44_v4 = vld [vmem:[%s285_s3 + $0x8] sm:$0xff]  ;;  %v152_v32 = vstv %s294_s9 }
   0x2   :  { %v42_v1 = vld [vmem:[%s286_s2 + $0x18] sm:$0xff]  ;;  %63 = vmatpush.msra.mxu0 %v46_v0  ;;  %v41_v3 = vld [vmem:[%s286_s2 + $0x10] sm:$0xff]  ;;  %v40_v5 = vld [vmem:[%s286_s2 + $0x8] sm:$0xff] }
   0x3   :  { %86 = vmatpush.msra.mxu1 %v42_v1  ;;  %v37_v6 = vld [vmem:[%s287_s1] sm:$0x3f]  ;;  %v103_v11 = vld [vmem:[%s291_s5 + $0x18] sm:$0xff]  ;;  %v102_v12 = vld [vmem:[%s291_s5 + $0x10] sm:$0xff] }
   0x4   :  { %64 = vmatpush.msra.mxu0 %v45_v2  ;;  %v36_v7 = vld [vmem:[%s288_s0] sm:$0x3f]  ;;  %123 = vmatpush.msra.mxu2 %v103_v11  ;;  %v101_v13 = vld [vmem:[%s291_s5 + $0x8] sm:$0xff] }
   0x5   :  { %87 = vmatpush.msra.mxu1 %v41_v3  ;;  %v43_v8 = vld [vmem:[%s285_s3] sm:$0xff]  ;;  %v38_v10 = vmul.f32 %v37_v6, %v36_v7 }
   0x6   :  { %v39_v9 = vld [vmem:[%s286_s2] sm:$0xff]  ;;  %65 = vmatpush.msra.mxu0 %v44_v4  ;;  %124 = vmatpush.msra.mxu2 %v102_v12 }
   0x7   :  { %88 = vmatpush.msra.mxu1 %v40_v5  ;;  %v100_v14 = vld [vmem:[%s291_s5] sm:$0xff] }
   0x8   :  { %66 = vmatpush.msra.mxu0 %v43_v8  ;;  %125 = vmatpush.msra.mxu2 %v101_v13  ;;  %v163_v15 = vld [vmem:[%s289_s4] ss:$0 sm:$0xff] }
   0x9   :  { %89 = vmatpush.msra.mxu1 %v39_v9  ;;  %160 = vmatmul.msk.f32.vlgmr.msra.gmra.mxu0 %vm47_vm0, %v37_v6  ;;  %v165_v21 = vld [vmem:[%s292_s7] ss:$0 sm:$0xff] }
   0xa   :  { %161 = vmatmul.msk.f32.vlgmr.msra.gmra.mxu1 %vm47_vm0, %v36_v7  ;;  %126 = vmatpush.msra.mxu2 %v100_v14  ;;  %v136_v22 = vmul.f32 %v165_v21, %v38_v10  ;;  %v164_v24 = vld [vmem:[%s290_s6] ss:$0 sm:$0xff] }
   0xb   :  { %v166_v27 = vld [vmem:[%s293_s8] ss:$0 sm:$0xff] }
   0xc   :  { %v138_v23 = vsel %vm137_vm1, %v136_v22, 0.0 }
   0xd   :  { %139 = vadd.xlane.f32.xlu0 %v138_v23 }
  0x80   :  { %v140_v31 = vpop.xlane.xlu0 %139 }
  0x86   :  { %v68_v16 = vpop.f32.mrf.mxu0 }
  0x87   :  { %v91_v17 = vpop.f32.mrf.mxu1 }
  0x88   :  { %v92_v18 = vadd.f32 %v91_v17, %v68_v16 }
  0x8a   :  { %v98_v19 = vadd.f32 %v163_v15, %v92_v18 }
  0x8c   :  { %v99_v20 = vmax.f32 %v98_v19, 0.0 }
  0x8e   :  { %162 = vmatmul.msk.f32.vlgmr.msra.gmra.mxu2 %vm47_vm0, %v99_v20 }
 0x111   :  { %v128_v25 = vpop.f32.mrf.mxu2 }
 0x112   :  { %v129_v26 = vadd.f32 %v164_v24, %v128_v25 }
 0x114   :  { %v131_v28 = vmax.f32 %v129_v26, 0.0 }
 0x116   :  { %v145_v29 = vmul.f32 %v166_v27, %v131_v28 }
 0x118   :  { %v147_v30 = vsel %vm146_vm2, %v145_v29, 0.0 }
 0x119   :  { %148 = vadd.xlane.f32.xlu0 %v147_v30 }
 0x18c   :  { %v149_v33 = vpop.xlane.xlu0 %148 }
 0x18d   :  { %v150_v34 = vadd.f32 %v149_v33, %v140_v31 }
 0x18f   :  { %v153_v35 = vadd.f32 %v152_v32, %v150_v34 }
 0x191   :  { %155 = vst.msk [vmem:[%s295_s10] sm:$0x3f] %vm154_vm3, %v153_v35 }

// kernel: ngcfmfmlp_forward.5
= control target key start
LH: loop header
LB: loop body
LE: loop exit
PB: predicated region body
PF: predicated region fallthrough
CT: control target
= control target key end

     0   :  { %s470_s1 = inlined_call_operand.vmem [shape: f32[128,128], index: 1, kind: input, shape index: {}]   ;;  %s471_s0 = inlined_call_operand.vmem [shape: bf16[128,128], index: 0, kind: input, shape index: {}]   ;;  %s472_s2 = inlined_call_operand.vmem [shape: f32[128,128], index: 2, kind: output, shape index: {}]  }
   0x1   :  { %v45_v0 = vld [vmem:[%s470_s1 + $0x70] sm:$0xff]  ;;  %v46_v1 = vld [vmem:[%s470_s1 + $0x78] sm:$0xff]  ;;  %v43_v2 = vld [vmem:[%s470_s1 + $0x60] sm:$0xff] }
   0x2   :  { %v61_v3 = vmul.f32 %v45_v0, %v45_v0  ;;  %v62_v4 = vmul.f32 %v46_v1, %v46_v1  ;;  %v44_v5 = vld [vmem:[%s470_s1 + $0x68] sm:$0xff]  ;;  %v59_v6 = vmul.f32 %v43_v2, %v43_v2  ;;  %v41_v8 = vld [vmem:[%s470_s1 + $0x50] sm:$0xff]  ;;  %v42_v9 = vld [vmem:[%s470_s1 + $0x58] sm:$0xff] }
   0x3   :  { %v60_v7 = vmul.f32 %v44_v5, %v44_v5  ;;  %v57_v12 = vmul.f32 %v41_v8, %v41_v8  ;;  %v58_v13 = vmul.f32 %v42_v9, %v42_v9  ;;  %v39_v14 = vld [vmem:[%s470_s1 + $0x40] sm:$0xff]  ;;  %v40_v15 = vld [vmem:[%s470_s1 + $0x48] sm:$0xff]  ;;  %v37_v19 = vld [vmem:[%s470_s1 + $0x30] sm:$0xff] }
   0x4   :  { %v70_v10 = vpack.c.bf16 %v62_v4, %v61_v3  ;;  %v55_v17 = vmul.f32 %v39_v14, %v39_v14  ;;  %v56_v18 = vmul.f32 %v40_v15, %v40_v15  ;;  %v38_v20 = vld [vmem:[%s470_s1 + $0x38] sm:$0xff]  ;;  %v53_v22 = vmul.f32 %v37_v19, %v37_v19  ;;  %v35_v24 = vld [vmem:[%s470_s1 + $0x20] sm:$0xff]  ;;  %v36_v25 = vld [vmem:[%s470_s1 + $0x28] sm:$0xff] }
   0x5   :  { %v69_v11 = vpack.c.bf16 %v60_v7, %v59_v6  ;;  %v68_v16 = vpack.c.bf16 %v58_v13, %v57_v12  ;;  %v54_v23 = vmul.f32 %v38_v20, %v38_v20  ;;  %v51_v27 = vmul.f32 %v35_v24, %v35_v24  ;;  %v33_v29 = vld [vmem:[%s470_s1 + $0x10] sm:$0xff]  ;;  %v34_v30 = vld [vmem:[%s470_s1 + $0x18] sm:$0xff]  ;;  %v31_v34 = vld [vmem:[%s470_s1] sm:$0xff] }
   0x6   :  { %151 = vmatpush.bf16.msra.mxu0 %v70_v10  ;;  %311 = vmatpush.bf16.msra.mxu1 %v70_v10  ;;  %v67_v21 = vpack.c.bf16 %v56_v18, %v55_v17  ;;  %v52_v28 = vmul.f32 %v36_v25, %v36_v25  ;;  %v49_v32 = vmul.f32 %v33_v29, %v33_v29  ;;  %v32_v35 = vld [vmem:[%s470_s1 + $0x8] sm:$0xff]  ;;  %v303_v40 = vld [vmem:[%s471_s0] sm:$0xff]  ;;  %v305_v41 = vld [vmem:[%s471_s0 + $0x10] sm:$0xff] }
   0x7   :  { %312 = vmatpush.bf16.msra.mxu2 %v70_v10  ;;  %313 = vmatpush.bf16.msra.mxu3 %v70_v10  ;;  %v66_v26 = vpack.c.bf16 %v54_v23, %v53_v22  ;;  %v50_v33 = vmul.f32 %v34_v30, %v34_v30  ;;  %v47_v37 = vmul.f32 %v31_v34, %v31_v34  ;;  %v307_v42 = vld [vmem:[%s471_s0 + $0x20] sm:$0xff]  ;;  %v309_v43 = vld [vmem:[%s471_s0 + $0x30] sm:$0xff]  ;;  %v304_v44 = vld [vmem:[%s471_s0 + $0x8] sm:$0xff] }
   0x8   :  { %v65_v31 = vpack.c.bf16 %v52_v28, %v51_v27  ;;  %v48_v38 = vmul.f32 %v32_v35, %v32_v35  ;;  %v306_v45 = vld [vmem:[%s471_s0 + $0x18] sm:$0xff]  ;;  %v308_v46 = vld [vmem:[%s471_s0 + $0x28] sm:$0xff] }
   0x9   :  { %v64_v36 = vpack.c.bf16 %v50_v33, %v49_v32  ;;  %v310_v47 = vld [vmem:[%s471_s0 + $0x38] sm:$0xff] }
   0xa   :  { %152 = vmatpush.bf16.msra.mxu0 %v69_v11  ;;  %314 = vmatpush.bf16.msra.mxu1 %v69_v11  ;;  %v63_v39 = vpack.c.bf16 %v48_v38, %v47_v37 }
   0xb   :  { %315 = vmatpush.bf16.msra.mxu2 %v69_v11  ;;  %316 = vmatpush.bf16.msra.mxu3 %v69_v11 }
   0xe   :  { %153 = vmatpush.bf16.msra.mxu0 %v68_v16  ;;  %317 = vmatpush.bf16.msra.mxu1 %v68_v16 }
   0xf   :  { %318 = vmatpush.bf16.msra.mxu2 %v68_v16  ;;  %319 = vmatpush.bf16.msra.mxu3 %v68_v16 }
  0x12   :  { %154 = vmatpush.bf16.msra.mxu0 %v67_v21  ;;  %320 = vmatpush.bf16.msra.mxu1 %v67_v21 }
  0x13   :  { %321 = vmatpush.bf16.msra.mxu2 %v67_v21  ;;  %322 = vmatpush.bf16.msra.mxu3 %v67_v21 }
  0x16   :  { %155 = vmatpush.bf16.msra.mxu0 %v66_v26  ;;  %323 = vmatpush.bf16.msra.mxu1 %v66_v26 }
  0x17   :  { %324 = vmatpush.bf16.msra.mxu2 %v66_v26  ;;  %325 = vmatpush.bf16.msra.mxu3 %v66_v26 }
  0x1a   :  { %156 = vmatpush.bf16.msra.mxu0 %v65_v31  ;;  %326 = vmatpush.bf16.msra.mxu1 %v65_v31 }
  0x1b   :  { %327 = vmatpush.bf16.msra.mxu2 %v65_v31  ;;  %328 = vmatpush.bf16.msra.mxu3 %v65_v31 }
  0x1e   :  { %157 = vmatpush.bf16.msra.mxu0 %v64_v36  ;;  %329 = vmatpush.bf16.msra.mxu1 %v64_v36 }
  0x1f   :  { %330 = vmatpush.bf16.msra.mxu2 %v64_v36  ;;  %331 = vmatpush.bf16.msra.mxu3 %v64_v36 }
  0x22   :  { %158 = vmatpush.bf16.msra.mxu0 %v63_v39  ;;  %332 = vmatpush.bf16.msra.mxu1 %v63_v39 }
  0x23   :  { %333 = vmatpush.bf16.msra.mxu2 %v63_v39  ;;  %334 = vmatpush.bf16.msra.mxu3 %v63_v39 }
  0x25   :  { %159 = vmatmul.bf16.vlgmr.msra.gmra.mxu0 %v303_v40  ;;  %169 = vmatmul.bf16.vlgmr.msra.gmra.mxu1 %v305_v41 }
  0x26   :  { %179 = vmatmul.bf16.vlgmr.msra.gmra.mxu2 %v307_v42  ;;  %189 = vmatmul.bf16.vlgmr.msra.gmra.mxu3 %v309_v43 }
  0x35   :  { %164 = vmatmul.bf16.gmra.mxu0 %v304_v44  ;;  %174 = vmatmul.bf16.gmra.mxu1 %v306_v45 }
  0x36   :  { %184 = vmatmul.bf16.gmra.mxu2 %v308_v46  ;;  %194 = vmatmul.bf16.gmra.mxu3 %v310_v47 }
  0xa2   :  { %v160_v48 = vpop.f32.mrf.mxu0  ;;  %v170_v49 = vpop.f32.mrf.mxu1 }
  0xa3   :  { %251 = vst [vmem:[%s472_s2] sm:$0xff] %v160_v48 }
  0xa4   :  { %255 = vst [vmem:[%s472_s2 + $0x20] sm:$0xff] %v170_v49 }
  0xa9   :  { %v180_v50 = vpop.f32.mrf.mxu2  ;;  %v190_v51 = vpop.f32.mrf.mxu3 }
  0xaa   :  { %259 = vst [vmem:[%s472_s2 + $0x40] sm:$0xff] %v180_v50  ;;  %v162_v52 = vpop.f32.mrf.mxu0  ;;  %v172_v53 = vpop.f32.mrf.mxu1 }
  0xab   :  { %263 = vst [vmem:[%s472_s2 + $0x60] sm:$0xff] %v190_v51 }
  0xac   :  { %252 = vst [vmem:[%s472_s2 + $0x8] sm:$0xff] %v162_v52 }
  0xad   :  { %256 = vst [vmem:[%s472_s2 + $0x28] sm:$0xff] %v172_v53 }
  0xb1   :  { %v182_v54 = vpop.f32.mrf.mxu2  ;;  %v192_v55 = vpop.f32.mrf.mxu3 }
  0xb2   :  { %260 = vst [vmem:[%s472_s2 + $0x48] sm:$0xff] %v182_v54  ;;  %v165_v56 = vpop.f32.mrf.mxu0  ;;  %v175_v57 = vpop.f32.mrf.mxu1 }
  0xb3   :  { %264 = vst [vmem:[%s472_s2 + $0x68] sm:$0xff] %v192_v55 }
  0xb4   :  { %253 = vst [vmem:[%s472_s2 + $0x10] sm:$0xff] %v165_v56 }
  0xb5   :  { %257 = vst [vmem:[%s472_s2 + $0x30] sm:$0xff] %v175_v57 }
  0xb9   :  { %v185_v58 = vpop.f32.mrf.mxu2  ;;  %v195_v59 = vpop.f32.mrf.mxu3 }
  0xba   :  { %261 = vst [vmem:[%s472_s2 + $0x50] sm:$0xff] %v185_v58  ;;  %v167_v60 = vpop.f32.mrf.mxu0  ;;  %v177_v61 = vpop.f32.mrf.mxu1 }
  0xbb   :  { %265 = vst [vmem:[%s472_s2 + $0x70] sm:$0xff] %v195_v59 }
  0xbc   :  { %254 = vst [vmem:[%s472_s2 + $0x18] sm:$0xff] %v167_v60 }
  0xbd   :  { %258 = vst [vmem:[%s472_s2 + $0x38] sm:$0xff] %v177_v61 }
  0xc1   :  { %v187_v62 = vpop.f32.mrf.mxu2  ;;  %v197_v63 = vpop.f32.mrf.mxu3 }
  0xc2   :  { %262 = vst [vmem:[%s472_s2 + $0x58] sm:$0xff] %v187_v62 }
  0xc3   :  { %266 = vst [vmem:[%s472_s2 + $0x78] sm:$0xff] %v197_v63 }

// kernel: ngcfmfmlp_forward.6
= control target key start
LH: loop header
LB: loop body
LE: loop exit
PB: predicated region body
PF: predicated region fallthrough
CT: control target
= control target key end

     0   :  { %s689_s1 = inlined_call_operand.vmem [shape: f32[128,128], index: 1, kind: input, shape index: {}]   ;;  %s690_s0 = inlined_call_operand.vmem [shape: bf16[128,128], index: 0, kind: input, shape index: {}]   ;;  %s691_s2 = inlined_call_operand.vmem [shape: bf16[128,128], index: 2, kind: input, shape index: {}]   ;;  %s692_s3 = inlined_call_operand.vmem [shape: f32[1,128], index: 3, kind: input, shape index: {}]   ;;  %s693_s4 = inlined_call_operand.vmem [shape: f32[128,128], index: 4, kind: output, shape index: {}]  }
   0x1   :  { %v83_v0 = vld [vmem:[%s689_s1 + $0x70] sm:$0xff]  ;;  %v84_v1 = vld [vmem:[%s689_s1 + $0x78] sm:$0xff]  ;;  %v81_v2 = vld [vmem:[%s689_s1 + $0x60] sm:$0xff] }
   0x2   :  { %v92_v3 = vpack.c.bf16 %v84_v1, %v83_v0  ;;  %v82_v4 = vld [vmem:[%s689_s1 + $0x68] sm:$0xff]  ;;  %v79_v6 = vld [vmem:[%s689_s1 + $0x50] sm:$0xff]  ;;  %v80_v7 = vld [vmem:[%s689_s1 + $0x58] sm:$0xff] }
   0x3   :  { %v91_v5 = vpack.c.bf16 %v82_v4, %v81_v2  ;;  %v90_v8 = vpack.c.bf16 %v80_v7, %v79_v6  ;;  %v77_v9 = vld [vmem:[%s689_s1 + $0x40] sm:$0xff]  ;;  %v78_v10 = vld [vmem:[%s689_s1 + $0x48] sm:$0xff]  ;;  %v75_v12 = vld [vmem:[%s689_s1 + $0x30] sm:$0xff] }
   0x4   :  { %141 = vmatpush.bf16.msra.mxu0 %v92_v3  ;;  %482 = vmatpush.bf16.msra.mxu2 %v92_v3  ;;  %v89_v11 = vpack.c.bf16 %v78_v10, %v77_v9  ;;  %v76_v13 = vld [vmem:[%s689_s1 + $0x38] sm:$0xff]  ;;  %v73_v15 = vld [vmem:[%s689_s1 + $0x20] sm:$0xff]  ;;  %v74_v16 = vld [vmem:[%s689_s1 + $0x28] sm:$0xff] }
   0x5   :  { %v88_v14 = vpack.c.bf16 %v76_v13, %v75_v12  ;;  %v87_v17 = vpack.c.bf16 %v74_v16, %v73_v15  ;;  %v71_v18 = vld [vmem:[%s689_s1 + $0x10] sm:$0xff]  ;;  %v72_v19 = vld [vmem:[%s689_s1 + $0x18] sm:$0xff]  ;;  %v69_v21 = vld [vmem:[%s689_s1] sm:$0xff] }
   0x6   :  { %v86_v20 = vpack.c.bf16 %v72_v19, %v71_v18  ;;  %v70_v22 = vld [vmem:[%s689_s1 + $0x8] sm:$0xff]  ;;  %v466_v24 = vld [vmem:[%s690_s0] sm:$0xff]  ;;  %v481_v28 = vld [vmem:[%s691_s2 + $0x38] sm:$0xff] }
   0x7   :  { %v85_v23 = vpack.c.bf16 %v70_v22, %v69_v21  ;;  %v470_v25 = vld [vmem:[%s690_s0 + $0x20] sm:$0xff]  ;;  %v467_v26 = vld [vmem:[%s690_s0 + $0x8] sm:$0xff]  ;;  %317 = vmatpush.bf16.msra.mxu1 %v481_v28  ;;  %v480_v29 = vld [vmem:[%s691_s2 + $0x30] sm:$0xff]  ;;  %490 = vmatpush.bf16.msra.mxu3 %v481_v28 }
   0x8   :  { %142 = vmatpush.bf16.msra.mxu0 %v91_v5  ;;  %483 = vmatpush.bf16.msra.mxu2 %v91_v5  ;;  %v471_v27 = vld [vmem:[%s690_s0 + $0x28] sm:$0xff]  ;;  %v478_v31 = vld [vmem:[%s691_s2 + $0x20] sm:$0xff]  ;;  %v468_v32 = vld [vmem:[%s690_s0 + $0x10] sm:$0xff] }
   0x9   :  { %v479_v30 = vld [vmem:[%s691_s2 + $0x28] sm:$0xff]  ;;  %v472_v33 = vld [vmem:[%s690_s0 + $0x30] sm:$0xff]  ;;  %v477_v34 = vld [vmem:[%s691_s2 + $0x18] sm:$0xff] }
   0xa   :  { %v469_v35 = vld [vmem:[%s690_s0 + $0x18] sm:$0xff]  ;;  %v476_v37 = vld [vmem:[%s691_s2 + $0x10] sm:$0xff]  ;;  %v475_v38 = vld [vmem:[%s691_s2 + $0x8] sm:$0xff] }
   0xb   :  { %318 = vmatpush.bf16.msra.mxu1 %v480_v29  ;;  %491 = vmatpush.bf16.msra.mxu3 %v480_v29  ;;  %v473_v36 = vld [vmem:[%s690_s0 + $0x38] sm:$0xff]  ;;  %v474_v39 = vld [vmem:[%s691_s2] sm:$0xff] }
   0xc   :  { %143 = vmatpush.bf16.msra.mxu0 %v90_v8  ;;  %484 = vmatpush.bf16.msra.mxu2 %v90_v8  ;;  %v623_v0 = vld [vmem:[%s692_s3] ss:$0 sm:$0xff] }
   0xf   :  { %319 = vmatpush.bf16.msra.mxu1 %v479_v30  ;;  %492 = vmatpush.bf16.msra.mxu3 %v479_v30 }
  0x10   :  { %144 = vmatpush.bf16.msra.mxu0 %v89_v11  ;;  %485 = vmatpush.bf16.msra.mxu2 %v89_v11 }
  0x13   :  { %320 = vmatpush.bf16.msra.mxu1 %v478_v31  ;;  %493 = vmatpush.bf16.msra.mxu3 %v478_v31 }
  0x14   :  { %145 = vmatpush.bf16.msra.mxu0 %v88_v14  ;;  %486 = vmatpush.bf16.msra.mxu2 %v88_v14 }
  0x17   :  { %321 = vmatpush.bf16.msra.mxu1 %v477_v34  ;;  %494 = vmatpush.bf16.msra.mxu3 %v477_v34 }
  0x18   :  { %146 = vmatpush.bf16.msra.mxu0 %v87_v17  ;;  %487 = vmatpush.bf16.msra.mxu2 %v87_v17 }
  0x1b   :  { %322 = vmatpush.bf16.msra.mxu1 %v476_v37  ;;  %495 = vmatpush.bf16.msra.mxu3 %v476_v37 }
  0x1c   :  { %147 = vmatpush.bf16.msra.mxu0 %v86_v20  ;;  %488 = vmatpush.bf16.msra.mxu2 %v86_v20 }
  0x1f   :  { %323 = vmatpush.bf16.msra.mxu1 %v475_v38  ;;  %496 = vmatpush.bf16.msra.mxu3 %v475_v38 }
  0x20   :  { %148 = vmatpush.bf16.msra.mxu0 %v85_v23  ;;  %489 = vmatpush.bf16.msra.mxu2 %v85_v23 }
  0x23   :  { %149 = vmatmul.bf16.vlgmr.msra.gmra.mxu0 %v466_v24  ;;  %169 = vmatmul.bf16.vlgmr.msra.gmra.mxu2 %v470_v25 }
  0x24   :  { %324 = vmatpush.bf16.msra.mxu1 %v474_v39  ;;  %497 = vmatpush.bf16.msra.mxu3 %v474_v39 }
  0x33   :  { %154 = vmatmul.bf16.gmra.mxu0 %v467_v26  ;;  %174 = vmatmul.bf16.gmra.mxu2 %v471_v27 }
  0x43   :  { %159 = vmatmul.bf16.gmra.mxu0 %v468_v32  ;;  %179 = vmatmul.bf16.gmra.mxu2 %v472_v33 }
  0x53   :  { %164 = vmatmul.bf16.gmra.mxu0 %v469_v35  ;;  %184 = vmatmul.bf16.gmra.mxu2 %v473_v36 }
  0xa0   :  { %v150_v40 = vpop.f32.mrf.mxu0 }
  0xa6   :  { %v170_v41 = vpop.f32.mrf.mxu2 }
  0xa8   :  { %v152_v42 = vpop.f32.mrf.mxu0 }
  0xa9   :  { %v241_v43 = vpack.c.bf16 %v152_v42, %v150_v40 }
  0xab   :  { %325 = vmatmul.bf16.vlgmr.msra.gmra.mxu1 %v241_v43 }
  0xae   :  { %v172_v44 = vpop.f32.mrf.mxu2 }
  0xaf   :  { %v245_v45 = vpack.c.bf16 %v172_v44, %v170_v41 }
  0xb0   :  { %v155_v46 = vpop.f32.mrf.mxu0 }
  0xb1   :  { %345 = vmatmul.bf16.vlgmr.msra.gmra.mxu3 %v245_v45 }
  0xb6   :  { %v175_v47 = vpop.f32.mrf.mxu2 }
  0xb8   :  { %v157_v48 = vpop.f32.mrf.mxu0 }
  0xb9   :  { %v242_v49 = vpack.c.bf16 %v157_v48, %v155_v46 }
  0xbb   :  { %330 = vmatmul.bf16.gmra.mxu1 %v242_v49 }
  0xbe   :  { %v177_v50 = vpop.f32.mrf.mxu2 }
  0xbf   :  { %v246_v51 = vpack.c.bf16 %v177_v50, %v175_v47 }
  0xc0   :  { %v160_v52 = vpop.f32.mrf.mxu0 }
  0xc1   :  { %350 = vmatmul.bf16.gmra.mxu3 %v246_v51 }
  0xc6   :  { %v180_v53 = vpop.f32.mrf.mxu2 }
  0xc8   :  { %v162_v54 = vpop.f32.mrf.mxu0 }
  0xc9   :  { %v243_v55 = vpack.c.bf16 %v162_v54, %v160_v52 }
  0xcb   :  { %335 = vmatmul.bf16.gmra.mxu1 %v243_v55 }
  0xce   :  { %v182_v56 = vpop.f32.mrf.mxu2 }
  0xcf   :  { %v247_v57 = vpack.c.bf16 %v182_v56, %v180_v53 }
  0xd0   :  { %v165_v58 = vpop.f32.mrf.mxu0 }
  0xd1   :  { %355 = vmatmul.bf16.gmra.mxu3 %v247_v57 }
  0xd6   :  { %v185_v59 = vpop.f32.mrf.mxu2 }
  0xd8   :  { %v167_v60 = vpop.f32.mrf.mxu0 }
  0xd9   :  { %v244_v61 = vpack.c.bf16 %v167_v60, %v165_v58 }
  0xdb   :  { %340 = vmatmul.bf16.gmra.mxu1 %v244_v61 }
  0xde   :  { %v187_v62 = vpop.f32.mrf.mxu2 }
  0xdf   :  { %v248_v63 = vpack.c.bf16 %v187_v62, %v185_v59 }
  0xe1   :  { %360 = vmatmul.bf16.gmra.mxu3 %v248_v63 }
 0x128   :  { %v326_v1 = vpop.f32.mrf.mxu1 }
 0x129   :  { %v327_v2 = vadd.f32 %v623_v0, %v326_v1 }
 0x12b   :  { %v366_v3 = vmax.f32 %v327_v2, 0.0 }
 0x12d   :  { %382 = vst [vmem:[%s693_s4] sm:$0xff] %v366_v3 }
 0x130   :  { %v328_v4 = vpop.f32.mrf.mxu1 }
 0x131   :  { %v329_v5 = vadd.f32 %v623_v0, %v328_v4 }
 0x133   :  { %v367_v6 = vmax.f32 %v329_v5, 0.0 }
 0x134   :  { %v346_v7 = vpop.f32.mrf.mxu3 }
 0x135   :  { %383 = vst [vmem:[%s693_s4 + $0x8] sm:$0xff] %v367_v6  ;;  %v347_v8 = vadd.f32 %v623_v0, %v346_v7 }
 0x137   :  { %v374_v9 = vmax.f32 %v347_v8, 0.0 }
 0x138   :  { %v331_v10 = vpop.f32.mrf.mxu1 }
 0x139   :  { %390 = vst [vmem:[%s693_s4 + $0x40] sm:$0xff] %v374_v9  ;;  %v332_v11 = vadd.f32 %v623_v0, %v331_v10 }
 0x13b   :  { %v368_v12 = vmax.f32 %v332_v11, 0.0 }
 0x13c   :  { %v348_v13 = vpop.f32.mrf.mxu3 }
 0x13d   :  { %384 = vst [vmem:[%s693_s4 + $0x10] sm:$0xff] %v368_v12  ;;  %v349_v14 = vadd.f32 %v623_v0, %v348_v13 }
 0x13f   :  { %v375_v15 = vmax.f32 %v349_v14, 0.0 }
 0x140   :  { %v333_v16 = vpop.f32.mrf.mxu1 }
 0x141   :  { %391 = vst [vmem:[%s693_s4 + $0x48] sm:$0xff] %v375_v15  ;;  %v334_v17 = vadd.f32 %v623_v0, %v333_v16 }
 0x143   :  { %v369_v18 = vmax.f32 %v334_v17, 0.0 }
 0x144   :  { %v351_v19 = vpop.f32.mrf.mxu3 }
 0x145   :  { %385 = vst [vmem:[%s693_s4 + $0x18] sm:$0xff] %v369_v18  ;;  %v352_v20 = vadd.f32 %v623_v0, %v351_v19 }
 0x147   :  { %v376_v21 = vmax.f32 %v352_v20, 0.0 }
 0x148   :  { %v336_v22 = vpop.f32.mrf.mxu1 }
 0x149   :  { %392 = vst [vmem:[%s693_s4 + $0x50] sm:$0xff] %v376_v21  ;;  %v337_v23 = vadd.f32 %v623_v0, %v336_v22 }
 0x14b   :  { %v370_v24 = vmax.f32 %v337_v23, 0.0 }
 0x14c   :  { %v353_v25 = vpop.f32.mrf.mxu3 }
 0x14d   :  { %386 = vst [vmem:[%s693_s4 + $0x20] sm:$0xff] %v370_v24  ;;  %v354_v26 = vadd.f32 %v623_v0, %v353_v25 }
 0x14f   :  { %v377_v27 = vmax.f32 %v354_v26, 0.0 }
 0x150   :  { %v338_v28 = vpop.f32.mrf.mxu1 }
 0x151   :  { %393 = vst [vmem:[%s693_s4 + $0x58] sm:$0xff] %v377_v27  ;;  %v339_v29 = vadd.f32 %v623_v0, %v338_v28 }
 0x153   :  { %v371_v30 = vmax.f32 %v339_v29, 0.0 }
 0x154   :  { %v356_v31 = vpop.f32.mrf.mxu3 }
 0x155   :  { %387 = vst [vmem:[%s693_s4 + $0x28] sm:$0xff] %v371_v30  ;;  %v357_v32 = vadd.f32 %v623_v0, %v356_v31 }
 0x157   :  { %v378_v33 = vmax.f32 %v357_v32, 0.0 }
 0x158   :  { %v341_v34 = vpop.f32.mrf.mxu1 }
 0x159   :  { %394 = vst [vmem:[%s693_s4 + $0x60] sm:$0xff] %v378_v33  ;;  %v342_v35 = vadd.f32 %v623_v0, %v341_v34 }
 0x15b   :  { %v372_v36 = vmax.f32 %v342_v35, 0.0 }
 0x15c   :  { %v358_v37 = vpop.f32.mrf.mxu3 }
 0x15d   :  { %388 = vst [vmem:[%s693_s4 + $0x30] sm:$0xff] %v372_v36  ;;  %v359_v38 = vadd.f32 %v623_v0, %v358_v37 }
 0x15f   :  { %v379_v39 = vmax.f32 %v359_v38, 0.0 }
 0x160   :  { %v343_v40 = vpop.f32.mrf.mxu1 }
 0x161   :  { %395 = vst [vmem:[%s693_s4 + $0x68] sm:$0xff] %v379_v39  ;;  %v344_v41 = vadd.f32 %v623_v0, %v343_v40 }
 0x163   :  { %v373_v42 = vmax.f32 %v344_v41, 0.0 }
 0x164   :  { %v361_v43 = vpop.f32.mrf.mxu3 }
 0x165   :  { %389 = vst [vmem:[%s693_s4 + $0x38] sm:$0xff] %v373_v42  ;;  %v362_v44 = vadd.f32 %v623_v0, %v361_v43 }
 0x167   :  { %v380_v45 = vmax.f32 %v362_v44, 0.0 }
 0x169   :  { %396 = vst [vmem:[%s693_s4 + $0x70] sm:$0xff] %v380_v45 }
 0x16c   :  { %v363_v46 = vpop.f32.mrf.mxu3 }
 0x16d   :  { %v364_v47 = vadd.f32 %v623_v0, %v363_v46 }
 0x16f   :  { %v381_v48 = vmax.f32 %v364_v47, 0.0 }
 0x171   :  { %397 = vst [vmem:[%s693_s4 + $0x78] sm:$0xff] %v381_v48 }

</bundles_post_ra>
